<compile_context>
chip_gen: v5e
topology: v5e:2x2
jax: 0.10.0
libtpu: 0.0.40
codegen_flags: <defaults>
</compile_context>

<pallas_src>
import functools

import jax
import jax.numpy as jnp
from jax.experimental import pallas as pl
from jax.experimental.pallas import tpu as pltpu

IN_FEATURES = 784
HIDDEN = 256
LN_EPS = 1e-5
LEAKY_SLOPE = 0.01          # PyTorch F.leaky_relu default
LANE = 128
DEFAULT_TILE_B = 512        # fits comfortably in scoped VMEM on v5e/v6e/v7x


def _round_up(n, m):
    return ((n + m - 1) // m) * m


def _linear_model_kernel(
    x_ref,        # (TB, 784)   f32   batch tile
    lab_ref,      # (TB, 2)     i32   [label, label_2] per row
    lam_ref,      # (1, 1)      f32   mixup lam (SMEM scalar)
    w1_ref,       # (784, 256)  bf16  input_layer.weight.T
    b1_ref,       # (1, 256)    f32
    emb_ref,      # (NC_PAD, 256) f32 label embedding table (row-padded)
    gamma_ref,    # (1, 256)    f32   layerNorm.weight
    beta_ref,     # (1, 256)    f32   layerNorm.bias
    w2_ref,       # (256, NC_PAD) bf16 fc.weight.T (col-padded)
    b2_ref,       # (1, NC_PAD) f32
    logits_ref,   # (TB, NC_PAD) f32
    feat_ref,     # (TB, 256)   f32
):
    # ---- input_layer (bf16 MXU, f32 accumulate) + leaky_relu ----
    xb = x_ref[...].astype(jnp.bfloat16)
    h = jnp.dot(xb, w1_ref[...], preferred_element_type=jnp.float32)
    h = h + b1_ref[...]
    h = jnp.where(h > 0, h, LEAKY_SLOPE * h)

    # ---- label embedding gather in-kernel: (lam*onehot1 + (1-lam)*onehot2) @ E ----
    tile_b = x_ref.shape[0]
    nc_pad = emb_ref.shape[0]
    labs = lab_ref[...]                                             # (TB, 2) i32
    iota = jax.lax.broadcasted_iota(jnp.int32, (tile_b, nc_pad), 1)
    lam = lam_ref[0, 0]
    oh1 = (iota == labs[:, 0:1]).astype(jnp.float32)
    oh2 = (iota == labs[:, 1:2]).astype(jnp.float32)
    mix = lam * oh1 + (1.0 - lam) * oh2
    emb = jnp.dot(mix, emb_ref[...], preferred_element_type=jnp.float32)

    # merge_concat=False path: additive label conditioning
    f = h + emb

    # ---- LayerNorm(256) (f32) ----
    mean = jnp.mean(f, axis=-1, keepdims=True)
    centered = f - mean
    var = jnp.mean(centered * centered, axis=-1, keepdims=True)
    f_ln = centered * jax.lax.rsqrt(var + LN_EPS)
    f_ln = f_ln * gamma_ref[...] + beta_ref[...]
    feat_ref[...] = f_ln.astype(feat_ref.dtype)

    # ---- fc head (lane-dense padded output) ----
    logits = jnp.dot(f_ln.astype(jnp.bfloat16), w2_ref[...],
                     preferred_element_type=jnp.float32)
    logits_ref[...] = (logits + b2_ref[...]).astype(logits_ref.dtype)


@functools.partial(jax.jit, static_argnames=("num_classes",))
def linear_model_forward(x, label, params, num_classes, label_2=None, lam=None):
    """Pallas forward for LinearModel (with_label=True, embedding_type='regular',
    merge_concat=False, activation=None, get_feat=True). Returns (logits, feature)."""
    B = x.shape[0]
    x_flat = x.reshape(B, -1).astype(jnp.float32)        # torch.flatten(x, 1)
    assert x_flat.shape[1] == IN_FEATURES

    nc_pad = _round_up(num_classes, LANE)

    # Mixup handling: with label_2=None the mix collapses exactly to E[label].
    if label_2 is None:
        label_b = label
        lam_val = jnp.float32(1.0)
    else:
        label_b = label_2
        lam_val = jnp.asarray(lam, jnp.float32)
    labs = jnp.stack([label.astype(jnp.int32), label_b.astype(jnp.int32)], axis=1)
    lam_arr = jnp.reshape(lam_val, (1, 1))

    # Params are stored pre-transposed ((in, out) == torch weight.T): no per-call .T.
    w1 = params["input_layer_w"].astype(jnp.bfloat16)                      # (784, 256)
    b1 = params["input_layer_b"].reshape(1, HIDDEN).astype(jnp.float32)
    gamma = params["ln_w"].reshape(1, HIDDEN).astype(jnp.float32)
    beta = params["ln_b"].reshape(1, HIDDEN).astype(jnp.float32)
    w2 = jnp.pad(params["fc_w"],
                 ((0, 0), (0, nc_pad - num_classes))).astype(jnp.bfloat16)  # (256, NC_PAD)
    b2 = jnp.pad(params["fc_b"],
                 (0, nc_pad - num_classes)).reshape(1, nc_pad).astype(jnp.float32)
    emb = jnp.pad(params["label_embedding"],
                  ((0, nc_pad - num_classes), (0, 0))).astype(jnp.float32)  # (NC_PAD, 256)

    tile_b = min(DEFAULT_TILE_B, _round_up(B, 8))
    grid = (pl.cdiv(B, tile_b),)

    def batch_spec(shape):
        return pl.BlockSpec(shape, lambda i: (i, 0))

    def const_spec(shape):
        return pl.BlockSpec(shape, lambda i: (0, 0))

    in_specs = [
        batch_spec((tile_b, IN_FEATURES)),                       # x tile
        batch_spec((tile_b, 2)),                                 # labels
        pl.BlockSpec(memory_space=pltpu.MemorySpace.SMEM),       # lam scalar
        const_spec((IN_FEATURES, HIDDEN)),                       # w1 (resident)
        const_spec((1, HIDDEN)),                                 # b1
        const_spec((nc_pad, HIDDEN)),                            # embedding table
        const_spec((1, HIDDEN)),                                 # gamma
        const_spec((1, HIDDEN)),                                 # beta
        const_spec((HIDDEN, nc_pad)),                            # w2
        const_spec((1, nc_pad)),                                 # b2
    ]
    out_specs = (
        batch_spec((tile_b, nc_pad)),                            # padded logits
        batch_spec((tile_b, HIDDEN)),                            # feature
    )
    out_shape = (
        jax.ShapeDtypeStruct((B, nc_pad), jnp.float32),
        jax.ShapeDtypeStruct((B, HIDDEN), jnp.float32),
    )

    logits_pad, feature = pl.pallas_call(
        _linear_model_kernel,
        grid=grid,
        in_specs=in_specs,
        out_specs=out_specs,
        out_shape=out_shape,
        compiler_params=pltpu.CompilerParams(
            dimension_semantics=("parallel",)),   # v7x: shard batch over 2 TCs
    )(x_flat, labs, lam_arr, w1, b1, emb, gamma, beta, w2, b2)

    return logits_pad[:, :num_classes], feature


def init_params(key, num_classes):
    ks = jax.random.split(key, 5)
    scale1 = 1.0 / jnp.sqrt(IN_FEATURES)
    scale2 = 1.0 / jnp.sqrt(HIDDEN)
    return {
        # nn.Linear(784, 256): stored as weight.T -> (784, 256) (same init dist)
        "input_layer_w": jax.random.uniform(ks[0], (IN_FEATURES, HIDDEN),
                                            jnp.float32, -scale1, scale1),
        "input_layer_b": jax.random.uniform(ks[1], (HIDDEN,),
                                            jnp.float32, -scale1, scale1),
        # nn.Linear(256, num_classes): stored as weight.T -> (256, C)
        "fc_w": jax.random.uniform(ks[2], (HIDDEN, num_classes),
                                   jnp.float32, -scale2, scale2),
        "fc_b": jax.random.uniform(ks[3], (num_classes,),
                                   jnp.float32, -scale2, scale2),
        # nn.Embedding(num_classes, 256) ~ N(0, 1)
        "label_embedding": jax.random.normal(ks[4], (num_classes, HIDDEN),
                                             jnp.float32),
        # nn.LayerNorm(256): weight=1, bias=0 at init
        "ln_w": jnp.ones((HIDDEN,), jnp.float32),
        "ln_b": jnp.zeros((HIDDEN,), jnp.float32),
    }
    # TODO(synk): SinCosLabelEncoding is not defined in the reference source;
    # the embedding_type='sin_cos' branch, the merge_concat/merge_fc branch and
    # the optional activation ('gelu'/'relu') branch are not implemented here
    # (the module's default path uses none of them).


if __name__ == "__main__":
    num_classes = 10
    key = jax.random.PRNGKey(0)
    k_params, k_x, k_lab = jax.random.split(key, 3)

    params = init_params(k_params, num_classes)

    # Small deterministic inputs: batch=8, MNIST-like (1, 28, 28) -> 784
    x = jax.random.normal(k_x, (8, 1, 28, 28), jnp.float32)
    label = jax.random.randint(k_lab, (8,), 0, num_classes)

    logits, feature = linear_model_forward(x, label, params, num_classes)
    jax.block_until_ready((logits, feature))

    assert logits.shape == (8, num_classes)
    assert feature.shape == (8, HIDDEN)
    assert bool(jnp.isfinite(logits).all()) and bool(jnp.isfinite(feature).all())
    print("KERNEL_OK")
</pallas_src>

<mosaic_0001>
module attributes {stable_mosaic.version = 11 : i64} {
  func.func @_linear_model_kernel(%arg0: i32, %arg1: memref<8x784xf32, #tpu.memory_space<vmem>>, %arg2: memref<8x2xi32, #tpu.memory_space<vmem>>, %arg3: memref<1x1xf32, #tpu.memory_space<smem>>, %arg4: memref<784x256xbf16, #tpu.memory_space<vmem>>, %arg5: memref<1x256xf32, #tpu.memory_space<vmem>>, %arg6: memref<128x256xf32, #tpu.memory_space<vmem>>, %arg7: memref<1x256xf32, #tpu.memory_space<vmem>>, %arg8: memref<1x256xf32, #tpu.memory_space<vmem>>, %arg9: memref<256x128xbf16, #tpu.memory_space<vmem>>, %arg10: memref<1x128xf32, #tpu.memory_space<vmem>>, %arg11: memref<8x128xf32, #tpu.memory_space<vmem>>, %arg12: memref<8x256xf32, #tpu.memory_space<vmem>>) attributes {dimension_semantics = [#tpu.dimension_semantics<parallel>], iteration_bounds = array<i64: 1>, scalar_prefetch = 0 : i64, scratch_operands = 0 : i64, tpu.core_type = #tpu.core_type<tc>, window_params = [{transform_indices = @transform_0, window_bounds = array<i64: 8, 784>}, {transform_indices = @transform_1, window_bounds = array<i64: 8, 2>}, {transform_indices = @transform_2, window_bounds = array<i64: 1, 1>}, {pipeline_mode = #tpu.pipeline_mode<synchronous>, transform_indices = @transform_3, window_bounds = array<i64: 784, 256>}, {pipeline_mode = #tpu.pipeline_mode<synchronous>, transform_indices = @transform_4, window_bounds = array<i64: 1, 256>}, {pipeline_mode = #tpu.pipeline_mode<synchronous>, transform_indices = @transform_5, window_bounds = array<i64: 128, 256>}, {pipeline_mode = #tpu.pipeline_mode<synchronous>, transform_indices = @transform_6, window_bounds = array<i64: 1, 256>}, {pipeline_mode = #tpu.pipeline_mode<synchronous>, transform_indices = @transform_7, window_bounds = array<i64: 1, 256>}, {pipeline_mode = #tpu.pipeline_mode<synchronous>, transform_indices = @transform_8, window_bounds = array<i64: 256, 128>}, {pipeline_mode = #tpu.pipeline_mode<synchronous>, transform_indices = @transform_9, window_bounds = array<i64: 1, 128>}, {transform_indices = @transform_10, window_bounds = array<i64: 8, 128>}, {transform_indices = @transform_11, window_bounds = array<i64: 8, 256>}]} {
    %c0 = arith.constant 0 : index
    %c0_0 = arith.constant 0 : index
    %0 = vector.load %arg1[%c0, %c0_0] : memref<8x784xf32, #tpu.memory_space<vmem>>, vector<8x784xf32>
    %1 = arith.truncf %0 : vector<8x784xf32> to vector<8x784xbf16>
    %c0_1 = arith.constant 0 : index
    %c0_2 = arith.constant 0 : index
    %2 = vector.load %arg4[%c0_1, %c0_2] : memref<784x256xbf16, #tpu.memory_space<vmem>>, vector<784x256xbf16>
    %cst = arith.constant dense<0.000000e+00> : vector<8x256xf32>
    %3 = tpu.matmul %1, %2, %cst {dimension_numbers = #tpu.dot_dimension_numbers<[1], [0], [0], [1], [0, 0, 1, 1], [], []>} : vector<8x784xbf16>, vector<784x256xbf16>, vector<8x256xf32> -> vector<8x256xf32>
    %c0_3 = arith.constant 0 : index
    %c0_4 = arith.constant 0 : index
    %4 = vector.load %arg5[%c0_3, %c0_4] : memref<1x256xf32, #tpu.memory_space<vmem>>, vector<1x256xf32>
    %5 = vector.broadcast %4 : vector<1x256xf32> to vector<8x256xf32>
    %6 = arith.addf %3, %5 : vector<8x256xf32>
    %cst_5 = arith.constant 0.000000e+00 : f32
    %7 = vector.broadcast %cst_5 : f32 to vector<8x256xf32>
    %8 = arith.cmpf ogt, %6, %7 : vector<8x256xf32>
    %cst_6 = arith.constant 0.00999999977 : f32
    %9 = vector.broadcast %cst_6 : f32 to vector<8x256xf32>
    %10 = arith.mulf %9, %6 : vector<8x256xf32>
    %11 = arith.select %8, %6, %10 : vector<8x256xi1>, vector<8x256xf32>
    %c0_7 = arith.constant 0 : index
    %c0_8 = arith.constant 0 : index
    %12 = vector.load %arg2[%c0_7, %c0_8] : memref<8x2xi32, #tpu.memory_space<vmem>>, vector<8x2xi32>
    %13 = tpu.iota {dimensions = array<i32: 1>} : vector<8x128xi32>
    %c0_9 = arith.constant 0 : index
    %c0_10 = arith.constant 0 : index
    %14 = memref.load %arg3[%c0_9, %c0_10] : memref<1x1xf32, #tpu.memory_space<smem>>
    %15 = vector.extract_strided_slice %12 {offsets = [0, 0], sizes = [8, 1], strides = [1, 1]} : vector<8x2xi32> to vector<8x1xi32>
    %16 = vector.broadcast %15 : vector<8x1xi32> to vector<8x128xi32>
    %17 = arith.cmpi eq, %13, %16 : vector<8x128xi32>
    %18 = arith.extui %17 : vector<8x128xi1> to vector<8x128xi32>
    %19 = arith.sitofp %18 : vector<8x128xi32> to vector<8x128xf32>
    %20 = vector.extract_strided_slice %12 {offsets = [0, 1], sizes = [8, 1], strides = [1, 1]} : vector<8x2xi32> to vector<8x1xi32>
    %21 = vector.broadcast %20 : vector<8x1xi32> to vector<8x128xi32>
    %22 = arith.cmpi eq, %13, %21 : vector<8x128xi32>
    %23 = arith.extui %22 : vector<8x128xi1> to vector<8x128xi32>
    %24 = arith.sitofp %23 : vector<8x128xi32> to vector<8x128xf32>
    %25 = vector.broadcast %14 : f32 to vector<8x128xf32>
    %26 = arith.mulf %25, %19 : vector<8x128xf32>
    %cst_11 = arith.constant 1.000000e+00 : f32
    %27 = arith.subf %cst_11, %14 : f32
    %28 = vector.broadcast %27 : f32 to vector<8x128xf32>
    %29 = arith.mulf %28, %24 : vector<8x128xf32>
    %30 = arith.addf %26, %29 : vector<8x128xf32>
    %c0_12 = arith.constant 0 : index
    %c0_13 = arith.constant 0 : index
    %31 = vector.load %arg6[%c0_12, %c0_13] : memref<128x256xf32, #tpu.memory_space<vmem>>, vector<128x256xf32>
    %cst_14 = arith.constant dense<0.000000e+00> : vector<8x256xf32>
    %32 = tpu.matmul %30, %31, %cst_14 {dimension_numbers = #tpu.dot_dimension_numbers<[1], [0], [0], [1], [0, 0, 1, 1], [], []>} : vector<8x128xf32>, vector<128x256xf32>, vector<8x256xf32> -> vector<8x256xf32>
    %33 = arith.addf %11, %32 : vector<8x256xf32>
    %cst_15 = arith.constant dense<0.000000e+00> : vector<8xf32>
    %34 = vector.multi_reduction <add>, %33, %cst_15 [1] : vector<8x256xf32> to vector<8xf32>
    %35 = vector.shape_cast %34 : vector<8xf32> to vector<8x1xf32>
    %cst_16 = arith.constant 2.560000e+02 : f32
    %36 = vector.broadcast %cst_16 : f32 to vector<8x1xf32>
    %37 = arith.divf %35, %36 : vector<8x1xf32>
    %38 = vector.broadcast %37 : vector<8x1xf32> to vector<8x256xf32>
    %39 = arith.subf %33, %38 : vector<8x256xf32>
    %40 = arith.mulf %39, %39 : vector<8x256xf32>
    %cst_17 = arith.constant dense<0.000000e+00> : vector<8xf32>
    %41 = vector.multi_reduction <add>, %40, %cst_17 [1] : vector<8x256xf32> to vector<8xf32>
    %42 = vector.shape_cast %41 : vector<8xf32> to vector<8x1xf32>
    %cst_18 = arith.constant 2.560000e+02 : f32
    %43 = vector.broadcast %cst_18 : f32 to vector<8x1xf32>
    %44 = arith.divf %42, %43 : vector<8x1xf32>
    %cst_19 = arith.constant 9.99999974E-6 : f32
    %45 = vector.broadcast %cst_19 : f32 to vector<8x1xf32>
    %46 = arith.addf %44, %45 : vector<8x1xf32>
    %47 = math.rsqrt %46 : vector<8x1xf32>
    %48 = vector.broadcast %47 : vector<8x1xf32> to vector<8x256xf32>
    %49 = arith.mulf %39, %48 : vector<8x256xf32>
    %c0_20 = arith.constant 0 : index
    %c0_21 = arith.constant 0 : index
    %50 = vector.load %arg7[%c0_20, %c0_21] : memref<1x256xf32, #tpu.memory_space<vmem>>, vector<1x256xf32>
    %51 = vector.broadcast %50 : vector<1x256xf32> to vector<8x256xf32>
    %52 = arith.mulf %49, %51 : vector<8x256xf32>
    %c0_22 = arith.constant 0 : index
    %c0_23 = arith.constant 0 : index
    %53 = vector.load %arg8[%c0_22, %c0_23] : memref<1x256xf32, #tpu.memory_space<vmem>>, vector<1x256xf32>
    %54 = vector.broadcast %53 : vector<1x256xf32> to vector<8x256xf32>
    %55 = arith.addf %52, %54 : vector<8x256xf32>
    %c0_24 = arith.constant 0 : index
    %c0_25 = arith.constant 0 : index
    %56 = vector.load %arg12[%c0_24, %c0_25] : memref<8x256xf32, #tpu.memory_space<vmem>>, vector<8x256xf32>
    tpu.vector_store %arg12[%c0_24, %c0_25], %55 {strides = array<i32>} : memref<8x256xf32, #tpu.memory_space<vmem>>, vector<8x256xf32>,
    %57 = arith.truncf %55 : vector<8x256xf32> to vector<8x256xbf16>
    %c0_26 = arith.constant 0 : index
    %c0_27 = arith.constant 0 : index
    %58 = vector.load %arg9[%c0_26, %c0_27] : memref<256x128xbf16, #tpu.memory_space<vmem>>, vector<256x128xbf16>
    %cst_28 = arith.constant dense<0.000000e+00> : vector<8x128xf32>
    %59 = tpu.matmul %57, %58, %cst_28 {dimension_numbers = #tpu.dot_dimension_numbers<[1], [0], [0], [1], [0, 0, 1, 1], [], []>} : vector<8x256xbf16>, vector<256x128xbf16>, vector<8x128xf32> -> vector<8x128xf32>
    %c0_29 = arith.constant 0 : index
    %c0_30 = arith.constant 0 : index
    %60 = vector.load %arg10[%c0_29, %c0_30] : memref<1x128xf32, #tpu.memory_space<vmem>>, vector<1x128xf32>
    %61 = vector.broadcast %60 : vector<1x128xf32> to vector<8x128xf32>
    %62 = arith.addf %59, %61 : vector<8x128xf32>
    %c0_31 = arith.constant 0 : index
    %c0_32 = arith.constant 0 : index
    %63 = vector.load %arg11[%c0_31, %c0_32] : memref<8x128xf32, #tpu.memory_space<vmem>>, vector<8x128xf32>
    tpu.vector_store %arg11[%c0_31, %c0_32], %62 {strides = array<i32>} : memref<8x128xf32, #tpu.memory_space<vmem>>, vector<8x128xf32>,
    return
  }
  func.func @transform_0(%arg0: i32) -> (i32, i32) {
    %c0_i32 = arith.constant 0 : i32
    %c0_i32_0 = arith.constant 0 : i32
    return %arg0, %c0_i32 : i32, i32
  }
  func.func @transform_1(%arg0: i32) -> (i32, i32) {
    %c0_i32 = arith.constant 0 : i32
    %c0_i32_0 = arith.constant 0 : i32
    return %arg0, %c0_i32 : i32, i32
  }
  func.func @transform_2(%arg0: i32) -> (i32, i32) {
    %c0_i32 = arith.constant 0 : i32
    %c0_i32_0 = arith.constant 0 : i32
    %c0_i32_1 = arith.constant 0 : i32
    return %c0_i32, %c0_i32_0 : i32, i32
  }
  func.func @transform_3(%arg0: i32) -> (i32, i32) {
    %c0_i32 = arith.constant 0 : i32
    %c0_i32_0 = arith.constant 0 : i32
    %c0_i32_1 = arith.constant 0 : i32
    return %c0_i32, %c0_i32_0 : i32, i32
  }
  func.func @transform_4(%arg0: i32) -> (i32, i32) {
    %c0_i32 = arith.constant 0 : i32
    %c0_i32_0 = arith.constant 0 : i32
    %c0_i32_1 = arith.constant 0 : i32
    return %c0_i32, %c0_i32_0 : i32, i32
  }
  func.func @transform_5(%arg0: i32) -> (i32, i32) {
    %c0_i32 = arith.constant 0 : i32
    %c0_i32_0 = arith.constant 0 : i32
    %c0_i32_1 = arith.constant 0 : i32
    return %c0_i32, %c0_i32_0 : i32, i32
  }
  func.func @transform_6(%arg0: i32) -> (i32, i32) {
    %c0_i32 = arith.constant 0 : i32
    %c0_i32_0 = arith.constant 0 : i32
    %c0_i32_1 = arith.constant 0 : i32
    return %c0_i32, %c0_i32_0 : i32, i32
  }
  func.func @transform_7(%arg0: i32) -> (i32, i32) {
    %c0_i32 = arith.constant 0 : i32
    %c0_i32_0 = arith.constant 0 : i32
    %c0_i32_1 = arith.constant 0 : i32
    return %c0_i32, %c0_i32_0 : i32, i32
  }
  func.func @transform_8(%arg0: i32) -> (i32, i32) {
    %c0_i32 = arith.constant 0 : i32
    %c0_i32_0 = arith.constant 0 : i32
    %c0_i32_1 = arith.constant 0 : i32
    return %c0_i32, %c0_i32_0 : i32, i32
  }
  func.func @transform_9(%arg0: i32) -> (i32, i32) {
    %c0_i32 = arith.constant 0 : i32
    %c0_i32_0 = arith.constant 0 : i32
    %c0_i32_1 = arith.constant 0 : i32
    return %c0_i32, %c0_i32_0 : i32, i32
  }
  func.func @transform_10(%arg0: i32) -> (i32, i32) {
    %c0_i32 = arith.constant 0 : i32
    %c0_i32_0 = arith.constant 0 : i32
    return %arg0, %c0_i32 : i32, i32
  }
  func.func @transform_11(%arg0: i32) -> (i32, i32) {
    %c0_i32 = arith.constant 0 : i32
    %c0_i32_0 = arith.constant 0 : i32
    return %arg0, %c0_i32 : i32, i32
  }
}

</mosaic_0001>

<bundles_post_ra>
// kernel: linear_model_forward.1
= control target key start
LH: loop header
LB: loop body
LE: loop exit
PB: predicated region body
PF: predicated region fallthrough
CT: control target
= control target key end

     0   :  { %18 = vsyncpa [#allocation4], 0  ;;  %v1819_v3 = vmov 0   ;;  %v1820_v40 = vmov 1   ;;  %vm649_vm0 = vcmask 130048   ;;  %s2695_s0 = inlined_call_operand.vmem [shape: f32[8,784], index: 0, kind: input, shape index: {}]   ;;  %s2696_s1 = inlined_call_operand.vmem [shape: s32[8,2], index: 1, kind: input, shape index: {}]   ;;  %s2697_s2 = inlined_call_operand.<no memory space> [shape: f32[1,1], index: 2, kind: input, shape index: {}]   ;;  %s2698_s3 = inlined_call_operand.vmem [shape: bf16[784,256], index: 3, kind: input, shape index: {}]   ;;  %s2699_s4 = inlined_call_operand.vmem [shape: f32[1,256], index: 4, kind: input, shape index: {}]   ;;  %s2700_s5 = inlined_call_operand.vmem [shape: f32[128,256], index: 5, kind: input, shape index: {}]   ;;  %s2701_s6 = inlined_call_operand.vmem [shape: f32[1,256], index: 6, kind: input, shape index: {}]   ;;  %s2702_s7 = inlined_call_operand.vmem [shape: f32[1,256], index: 7, kind: input, shape index: {}]   ;;  %s2703_s8 = inlined_call_operand.vmem [shape: bf16[256,128], index: 8, kind: input, shape index: {}]   ;;  %s2704_s9 = inlined_call_operand.vmem [shape: f32[1,128], index: 9, kind: input, shape index: {}]   ;;  %s2705_s10 = inlined_call_operand.hbm [shape: f32[8,128], index: 10, kind: output, shape index: {0}]   ;;  %s2706_s11 = inlined_call_operand.hbm [shape: f32[8,256], index: 11, kind: output, shape index: {1}]  }
   0x1   :  { %v841_v0 = vld [vmem:[%s2696_s1] sm:$0xff]  ;;  %v1238_v1 = vld [vmem:[%s2698_s3 + $0x70] sm:$0xf]  ;;  %v1655_v2 = vld [vmem:[%s2698_s3 + $0x74] sm:$0xf0]  ;;  %1760 = vset.pattern.permute.xlu0 %v1819_v3 }
   0x2   :  { %v1239_v4 = vor.u32 %v1655_v2, %v1238_v1  ;;  %v1430_v5 = vld [vmem:[%s2698_s3 + $0x1f0] sm:$0xf]  ;;  %v1703_v6 = vld [vmem:[%s2698_s3 + $0x1f4] sm:$0xf0]  ;;  %846 = vperm.xlu0 %1760, %v841_v0   ;;  %v1230_v10 = vld [vmem:[%s2698_s3 + $0x60] sm:$0xf] }
   0x3   :  { %v1302_v7 = vld [vmem:[%s2698_s3 + $0xf0] sm:$0xf]  ;;  %v1431_v8 = vor.u32 %v1703_v6, %v1430_v5  ;;  %v1671_v9 = vld [vmem:[%s2698_s3 + $0xf4] sm:$0xf0]  ;;  %v1653_v11 = vld [vmem:[%s2698_s3 + $0x64] sm:$0xf0] }
   0x4   :  { %653 = vmatpush.bf16.msra.mxu0 %v1239_v4  ;;  %v1303_v12 = vor.u32 %v1671_v9, %v1302_v7  ;;  %v1231_v13 = vor.u32 %v1653_v11, %v1230_v10  ;;  %v1422_v14 = vld [vmem:[%s2698_s3 + $0x1e0] sm:$0xf]  ;;  %v1701_v15 = vld [vmem:[%s2698_s3 + $0x1e4] sm:$0xf0]  ;;  %v1366_v19 = vld [vmem:[%s2698_s3 + $0x170] sm:$0xf] }
   0x5   :  { %v1294_v16 = vld [vmem:[%s2698_s3 + $0xe0] sm:$0xf]  ;;  %692 = vmatpush.bf16.msra.mxu3 %v1431_v8  ;;  %v1423_v17 = vor.u32 %v1701_v15, %v1422_v14  ;;  %v1669_v18 = vld [vmem:[%s2698_s3 + $0xe4] sm:$0xf0]  ;;  %v1687_v21 = vld [vmem:[%s2698_s3 + $0x174] sm:$0xf0] }
   0x6   :  { %666 = vmatpush.bf16.msra.mxu1 %v1303_v12  ;;  %v1295_v20 = vor.u32 %v1669_v18, %v1294_v16  ;;  %v1222_v22 = vld [vmem:[%s2698_s3 + $0x50] sm:$0xf]  ;;  %v1651_v23 = vld [vmem:[%s2698_s3 + $0x54] sm:$0xf0]  ;;  %v1367_v24 = vor.u32 %v1687_v21, %v1366_v19  ;;  %v1358_v30 = vld [vmem:[%s2698_s3 + $0x160] sm:$0xf] }
   0x7   :  { %v1414_v25 = vld [vmem:[%s2698_s3 + $0x1d0] sm:$0xf]  ;;  %v1699_v26 = vld [vmem:[%s2698_s3 + $0x1d4] sm:$0xf0]  ;;  %v1223_v28 = vor.u32 %v1651_v23, %v1222_v22  ;;  %v1685_v31 = vld [vmem:[%s2698_s3 + $0x164] sm:$0xf0] }
   0x8   :  { %v1286_v27 = vld [vmem:[%s2698_s3 + $0xd0] sm:$0xf]  ;;  %654 = vmatpush.bf16.msra.mxu0 %v1231_v13  ;;  %v1667_v29 = vld [vmem:[%s2698_s3 + $0xd4] sm:$0xf0]  ;;  %679 = vmatpush.bf16.msra.mxu2 %v1367_v24  ;;  %v1415_v32 = vor.u32 %v1699_v26, %v1414_v25  ;;  %v1359_v33 = vor.u32 %v1685_v31, %v1358_v30  ;;  %v1214_v34 = vld [vmem:[%s2698_s3 + $0x40] sm:$0xf] }
   0x9   :  { %693 = vmatpush.bf16.msra.mxu3 %v1423_v17  ;;  %v1649_v35 = vld [vmem:[%s2698_s3 + $0x44] sm:$0xf0]  ;;  %v1287_v36 = vor.u32 %v1667_v29, %v1286_v27  ;;  %v1406_v37 = vld [vmem:[%s2698_s3 + $0x1c0] sm:$0xf]  ;;  %v1350_v42 = vld [vmem:[%s2698_s3 + $0x150] sm:$0xf] }
   0xa   :  { %667 = vmatpush.bf16.msra.mxu1 %v1295_v20  ;;  %v1697_v38 = vld [vmem:[%s2698_s3 + $0x1c4] sm:$0xf0]  ;;  %v1278_v39 = vld [vmem:[%s2698_s3 + $0xc0] sm:$0xf]  ;;  %1761 = vset.pattern.permute.xlu0 %v1820_v40  ;;  %v1683_v43 = vld [vmem:[%s2698_s3 + $0x154] sm:$0xf0]  ;;  %v1215_v44 = vor.u32 %v1649_v35, %v1214_v34 }
   0xb   :  { %v1665_v41 = vld [vmem:[%s2698_s3 + $0xc4] sm:$0xf0]  ;;  %852 = vperm.xlu0 %1761, %v841_v0   ;;  %v1407_v45 = vor.u32 %v1697_v38, %v1406_v37  ;;  %v1351_v46 = vor.u32 %v1683_v43, %v1350_v42  ;;  %v1206_v47 = vld [vmem:[%s2698_s3 + $0x30] sm:$0xf]  ;;  %v1647_v48 = vld [vmem:[%s2698_s3 + $0x34] sm:$0xf0] }
   0xc   :  { %655 = vmatpush.bf16.msra.mxu0 %v1223_v28  ;;  %680 = vmatpush.bf16.msra.mxu2 %v1359_v33  ;;  %v1398_v49 = vld [vmem:[%s2698_s3 + $0x1b0] sm:$0xf]  ;;  %v1279_v50 = vor.u32 %v1665_v41, %v1278_v39  ;;  %v1695_v51 = vld [vmem:[%s2698_s3 + $0x1b4] sm:$0xf0]  ;;  %v1342_v52 = vld [vmem:[%s2698_s3 + $0x140] sm:$0xf]  ;;  %v1207_v56 = vor.u32 %v1647_v48, %v1206_v47 }
   0xd   :  { %694 = vmatpush.bf16.msra.mxu3 %v1415_v32  ;;  %v1681_v53 = vld [vmem:[%s2698_s3 + $0x144] sm:$0xf0]  ;;  %v1270_v54 = vld [vmem:[%s2698_s3 + $0xb0] sm:$0xf]  ;;  %v1663_v55 = vld [vmem:[%s2698_s3 + $0xb4] sm:$0xf0]  ;;  %v1399_v57 = vor.u32 %v1695_v51, %v1398_v49 }
   0xe   :  { %668 = vmatpush.bf16.msra.mxu1 %v1287_v36  ;;  %v1343_v58 = vor.u32 %v1681_v53, %v1342_v52  ;;  %v1198_v59 = vld [vmem:[%s2698_s3 + $0x20] sm:$0xf]  ;;  %v1645_v60 = vld [vmem:[%s2698_s3 + $0x24] sm:$0xf0]  ;;  %v1271_v62 = vor.u32 %v1663_v55, %v1270_v54  ;;  %v1334_v0 = vld [vmem:[%s2698_s3 + $0x130] sm:$0xf] }
   0xf   :  { %v1390_v61 = vld [vmem:[%s2698_s3 + $0x1a0] sm:$0xf]  ;;  %v1693_v63 = vld [vmem:[%s2698_s3 + $0x1a4] sm:$0xf0]  ;;  %v1679_v1 = vld [vmem:[%s2698_s3 + $0x134] sm:$0xf0]  ;;  %v1199_v4 = vor.u32 %v1645_v60, %v1198_v59 }
  0x10   :  { %656 = vmatpush.bf16.msra.mxu0 %v1215_v44  ;;  %681 = vmatpush.bf16.msra.mxu2 %v1351_v46  ;;  %v1262_v2 = vld [vmem:[%s2698_s3 + $0xa0] sm:$0xf]  ;;  %v1661_v3 = vld [vmem:[%s2698_s3 + $0xa4] sm:$0xf0]  ;;  %v1391_v5 = vor.u32 %v1693_v63, %v1390_v61  ;;  %v1335_v6 = vor.u32 %v1679_v1, %v1334_v0  ;;  %v1190_v7 = vld [vmem:[%s2698_s3 + $0x10] sm:$0xf] }
  0x11   :  { %695 = vmatpush.bf16.msra.mxu3 %v1407_v45  ;;  %v1643_v8 = vld [vmem:[%s2698_s3 + $0x14] sm:$0xf0]  ;;  %v1382_v9 = vld [vmem:[%s2698_s3 + $0x190] sm:$0xf]  ;;  %v1263_v10 = vor.u32 %v1661_v3, %v1262_v2  ;;  %v1326_v12 = vld [vmem:[%s2698_s3 + $0x120] sm:$0xf] }
  0x12   :  { %669 = vmatpush.bf16.msra.mxu1 %v1279_v50  ;;  %v1691_v11 = vld [vmem:[%s2698_s3 + $0x194] sm:$0xf0]  ;;  %v1677_v13 = vld [vmem:[%s2698_s3 + $0x124] sm:$0xf0]  ;;  %v1254_v14 = vld [vmem:[%s2698_s3 + $0x90] sm:$0xf]  ;;  %v1191_v16 = vor.u32 %v1643_v8, %v1190_v7 }
  0x13   :  { %v1659_v15 = vld [vmem:[%s2698_s3 + $0x94] sm:$0xf0]  ;;  %v1182_v17 = vld [vmem:[%s2698_s3] sm:$0xf]  ;;  %v1641_v18 = vld [vmem:[%s2698_s3 + $0x4] sm:$0xf0]  ;;  %v1383_v19 = vor.u32 %v1691_v11, %v1382_v9  ;;  %v1327_v20 = vor.u32 %v1677_v13, %v1326_v12 }
  0x14   :  { %657 = vmatpush.bf16.msra.mxu0 %v1207_v56  ;;  %682 = vmatpush.bf16.msra.mxu2 %v1343_v58  ;;  %v1374_v21 = vld [vmem:[%s2698_s3 + $0x180] sm:$0xf]  ;;  %v1689_v22 = vld [vmem:[%s2698_s3 + $0x184] sm:$0xf0]  ;;  %v1494_v23 = vld [vmem:[%s2698_s3 + $0x270] sm:$0xf]  ;;  %v1255_v24 = vor.u32 %v1659_v15, %v1254_v14  ;;  %v1183_v32 = vor.u32 %v1641_v18, %v1182_v17 }
  0x15   :  { %696 = vmatpush.bf16.msra.mxu3 %v1399_v57  ;;  %v1719_v25 = vld [vmem:[%s2698_s3 + $0x274] sm:$0xf0]  ;;  %v1246_v26 = vld [vmem:[%s2698_s3 + $0x80] sm:$0xf]  ;;  %v1657_v27 = vld [vmem:[%s2698_s3 + $0x84] sm:$0xf0]  ;;  %v1375_v36 = vor.u32 %v1689_v22, %v1374_v21 }
  0x16   :  { %670 = vmatpush.bf16.msra.mxu1 %v1271_v62  ;;  %v1318_v28 = vld [vmem:[%s2698_s3 + $0x110] sm:$0xf]  ;;  %v1675_v29 = vld [vmem:[%s2698_s3 + $0x114] sm:$0xf0]  ;;  %v1566_v34 = vld [vmem:[%s2698_s3 + $0x300] sm:$0xf]  ;;  %v1495_v37 = vor.u32 %v1719_v25, %v1494_v23  ;;  %v1247_v41 = vor.u32 %v1657_v27, %v1246_v26 }
  0x17   :  { %v1558_v30 = vld [vmem:[%s2698_s3 + $0x2f0] sm:$0xf]  ;;  %v44_v31 = vld [vmem:[%s2695_s0 + $0x18] sm:$0xff]  ;;  %v1737_v35 = vld [vmem:[%s2698_s3 + $0x304] sm:$0xf0]  ;;  %v1319_v42 = vor.u32 %v1675_v29, %v1318_v28 }
  0x18   :  { %658 = vmatpush.bf16.msra.mxu0 %v1199_v4  ;;  %683 = vmatpush.bf16.msra.mxu2 %v1335_v6  ;;  %v1735_v33 = vld [vmem:[%s2698_s3 + $0x2f4] sm:$0xf0]  ;;  %v1486_v38 = vld [vmem:[%s2698_s3 + $0x260] sm:$0xf]  ;;  %v1717_v39 = vld [vmem:[%s2698_s3 + $0x264] sm:$0xf0]  ;;  %v1567_v49 = vor.u32 %v1737_v35, %v1566_v34  ;;  %v2122_v51 = vpack.c.bf16 %v44_v31, %v44_v31 }
  0x19   :  { %697 = vmatpush.bf16.msra.mxu3 %v1391_v5  ;;  %v41_v40 = vld [vmem:[%s2695_s0] sm:$0xff]  ;;  %v1654_v44 = vld [vmem:[%s2698_s3 + $0x74] sm:$0xf]  ;;  %v1240_v45 = vld [vmem:[%s2698_s3 + $0x78] sm:$0xf0]  ;;  %v1559_v46 = vor.u32 %v1735_v33, %v1558_v30  ;;  %v1487_v56 = vor.u32 %v1717_v39, %v1486_v38 }
  0x1a   :  { %671 = vmatpush.bf16.msra.mxu1 %v1263_v10  ;;  %v1310_v43 = vld [vmem:[%s2698_s3 + $0x100] sm:$0xf]  ;;  %v1673_v47 = vld [vmem:[%s2698_s3 + $0x104] sm:$0xf0]  ;;  %v1670_v53 = vld [vmem:[%s2698_s3 + $0xf4] sm:$0xf]  ;;  %v2133_v55 = vpack.c.bf16 %v41_v40, %v41_v40  ;;  %v1243_v57 = vor.u32 %v1654_v44, %v1240_v45 }
  0x1b   :  { %v1550_v48 = vld [vmem:[%s2698_s3 + $0x2e0] sm:$0xf]  ;;  %v42_v50 = vld [vmem:[%s2695_s0 + $0x8] sm:$0xff]  ;;  %v1304_v54 = vld [vmem:[%s2698_s3 + $0xf8] sm:$0xf0]  ;;  %v1311_v58 = vor.u32 %v1673_v47, %v1310_v43 }
  0x1c   :  { %659 = vmatpush.bf16.msra.mxu0 %v1191_v16  ;;  %684 = vmatpush.bf16.msra.mxu2 %v1327_v20  ;;  %v1733_v52 = vld [vmem:[%s2698_s3 + $0x2e4] sm:$0xf0]  ;;  %v1478_v59 = vld [vmem:[%s2698_s3 + $0x250] sm:$0xf]  ;;  %v1715_v60 = vld [vmem:[%s2698_s3 + $0x254] sm:$0xf0]  ;;  %v2144_v62 = vpack.c.bf16 %v42_v50, %v42_v50  ;;  %v1307_v1 = vor.u32 %v1670_v53, %v1304_v54 }
  0x1d   :  { %698 = vmatpush.bf16.msra.mxu3 %v1383_v19  ;;  %v43_v61 = vld [vmem:[%s2695_s0 + $0x10] sm:$0xff]  ;;  %v1551_v63 = vor.u32 %v1733_v52, %v1550_v48  ;;  %v1652_v2 = vld [vmem:[%s2698_s3 + $0x64] sm:$0xf]  ;;  %v1232_v3 = vld [vmem:[%s2698_s3 + $0x68] sm:$0xf0]  ;;  %v1479_v7 = vor.u32 %v1715_v60, %v1478_v59 }
  0x1e   :  { %672 = vmatpush.bf16.msra.mxu1 %v1255_v24  ;;  %v1542_v0 = vld [vmem:[%s2698_s3 + $0x2d0] sm:$0xf]  ;;  %v1731_v4 = vld [vmem:[%s2698_s3 + $0x2d4] sm:$0xf0]  ;;  %v1668_v5 = vld [vmem:[%s2698_s3 + $0xe4] sm:$0xf]  ;;  %v2166_v8 = vpack.c.bf16 %v43_v61, %v43_v61  ;;  %v1235_v11 = vor.u32 %v1652_v2, %v1232_v3 }
  0x1f   :  { %v1296_v6 = vld [vmem:[%s2698_s3 + $0xe8] sm:$0xf0]  ;;  %v1470_v9 = vld [vmem:[%s2698_s3 + $0x240] sm:$0xf]  ;;  %v1713_v10 = vld [vmem:[%s2698_s3 + $0x244] sm:$0xf0]  ;;  %v1543_v12 = vor.u32 %v1731_v4, %v1542_v0 }
  0x20   :  { %660 = vmatpush.bf16.msra.mxu0 %v1183_v32  ;;  %685 = vmatpush.bf16.msra.mxu2 %v1319_v42  ;;  %v1534_v13 = vld [vmem:[%s2698_s3 + $0x2c0] sm:$0xf]  ;;  %v1299_v14 = vor.u32 %v1668_v5, %v1296_v6  ;;  %v1650_v15 = vld [vmem:[%s2698_s3 + $0x54] sm:$0xf]  ;;  %v1224_v16 = vld [vmem:[%s2698_s3 + $0x58] sm:$0xf0]  ;;  %v1471_v20 = vor.u32 %v1713_v10, %v1470_v9 }
  0x21   :  { %699 = vmatpush.bf16.msra.mxu3 %v1375_v36  ;;  %v1729_v17 = vld [vmem:[%s2698_s3 + $0x2c4] sm:$0xf0]  ;;  %v1666_v18 = vld [vmem:[%s2698_s3 + $0xd4] sm:$0xf]  ;;  %v1288_v19 = vld [vmem:[%s2698_s3 + $0xd8] sm:$0xf0]  ;;  %v1227_v23 = vor.u32 %v1650_v15, %v1224_v16 }
  0x22   :  { %673 = vmatpush.bf16.msra.mxu1 %v1247_v41  ;;  %v1462_v21 = vld [vmem:[%s2698_s3 + $0x230] sm:$0xf]  ;;  %v1711_v22 = vld [vmem:[%s2698_s3 + $0x234] sm:$0xf0]  ;;  %v1535_v24 = vor.u32 %v1729_v17, %v1534_v13  ;;  %v1291_v26 = vor.u32 %v1666_v18, %v1288_v19  ;;  %v1648_v27 = vld [vmem:[%s2698_s3 + $0x44] sm:$0xf] }
  0x23   :  { %661 = vmatmul.bf16.vlgmr.msra.gmra.mxu0 %v2133_v55  ;;  %v1526_v25 = vld [vmem:[%s2698_s3 + $0x2b0] sm:$0xf]  ;;  %v1216_v28 = vld [vmem:[%s2698_s3 + $0x48] sm:$0xf0]  ;;  %v1727_v29 = vld [vmem:[%s2698_s3 + $0x2b4] sm:$0xf0]  ;;  %v1463_v32 = vor.u32 %v1711_v22, %v1462_v21 }
  0x24   :  { %705 = vmatpush.bf16.msrb.mxu0 %v1495_v37  ;;  %700 = vmatmul.bf16.vlgmr.msra.gmra.mxu3 %v2122_v51  ;;  %v1664_v30 = vld [vmem:[%s2698_s3 + $0xc4] sm:$0xf]  ;;  %v1280_v31 = vld [vmem:[%s2698_s3 + $0xc8] sm:$0xf0]  ;;  %v47_v33 = vld [vmem:[%s2695_s0 + $0x30] sm:$0xff]  ;;  %v1219_v36 = vor.u32 %v1648_v27, %v1216_v28  ;;  %v1527_v37 = vor.u32 %v1727_v29, %v1526_v25 }
  0x25   :  { %738 = vmatpush.bf16.msrb.mxu3 %v1567_v49  ;;  %686 = vmatpush.bf16.msra.mxu2 %v1311_v58  ;;  %v1454_v34 = vld [vmem:[%s2698_s3 + $0x220] sm:$0xf]  ;;  %v1709_v35 = vld [vmem:[%s2698_s3 + $0x224] sm:$0xf0]  ;;  %v1283_v39 = vor.u32 %v1664_v30, %v1280_v31  ;;  %v1646_v40 = vld [vmem:[%s2698_s3 + $0x34] sm:$0xf]  ;;  %v2245_v45 = vpack.c.bf16 %v47_v33, %v47_v33 }
  0x26   :  { %718 = vmatpush.bf16.msrb.mxu1 %v1559_v46  ;;  %v1518_v38 = vld [vmem:[%s2698_s3 + $0x2a0] sm:$0xf]  ;;  %v1208_v41 = vld [vmem:[%s2698_s3 + $0x38] sm:$0xf0]  ;;  %v1725_v42 = vld [vmem:[%s2698_s3 + $0x2a4] sm:$0xf0]  ;;  %v1455_v46 = vor.u32 %v1709_v35, %v1454_v34 }
  0x27   :  { %674 = vmatmul.bf16.vlgmr.msra.gmra.mxu1 %v2144_v62  ;;  %v1662_v43 = vld [vmem:[%s2698_s3 + $0xb4] sm:$0xf]  ;;  %v1272_v44 = vld [vmem:[%s2698_s3 + $0xb8] sm:$0xf0]  ;;  %v1446_v47 = vld [vmem:[%s2698_s3 + $0x210] sm:$0xf]  ;;  %v1211_v49 = vor.u32 %v1646_v40, %v1208_v41  ;;  %v1519_v50 = vor.u32 %v1725_v42, %v1518_v38 }
  0x28   :  { %706 = vmatpush.bf16.msrb.mxu0 %v1487_v56  ;;  %687 = vmatmul.bf16.vlgmr.msra.gmra.mxu2 %v2166_v8  ;;  %v1707_v48 = vld [vmem:[%s2698_s3 + $0x214] sm:$0xf0]  ;;  %v1510_v52 = vld [vmem:[%s2698_s3 + $0x290] sm:$0xf]  ;;  %v1275_v53 = vor.u32 %v1662_v43, %v1272_v44  ;;  %v1644_v54 = vld [vmem:[%s2698_s3 + $0x24] sm:$0xf] }
  0x29   :  { %744 = vmatpush.bf16.msra.mxu3 %v1243_v57  ;;  %757 = vmatpush.bf16.msrb.mxu2 %v1307_v1  ;;  %v1200_v56 = vld [vmem:[%s2698_s3 + $0x28] sm:$0xf0]  ;;  %v1723_v57 = vld [vmem:[%s2698_s3 + $0x294] sm:$0xf0]  ;;  %v1660_v58 = vld [vmem:[%s2698_s3 + $0xa4] sm:$0xf]  ;;  %v1447_v60 = vor.u32 %v1707_v48, %v1446_v47 }
  0x2a   :  { %719 = vmatpush.bf16.msrb.mxu1 %v1551_v63  ;;  %v1264_v59 = vld [vmem:[%s2698_s3 + $0xa8] sm:$0xf0]  ;;  %v1438_v61 = vld [vmem:[%s2698_s3 + $0x200] sm:$0xf]  ;;  %v1705_v63 = vld [vmem:[%s2698_s3 + $0x204] sm:$0xf0]  ;;  %v1203_v0 = vor.u32 %v1644_v54, %v1200_v56  ;;  %v1511_v3 = vor.u32 %v1723_v57, %v1510_v52 }
  0x2b   :  { %v1502_v1 = vld [vmem:[%s2698_s3 + $0x280] sm:$0xf]  ;;  %v1642_v2 = vld [vmem:[%s2698_s3 + $0x14] sm:$0xf]  ;;  %v1267_v4 = vor.u32 %v1660_v58, %v1264_v59  ;;  %v1192_v5 = vld [vmem:[%s2698_s3 + $0x18] sm:$0xf0] }
  0x2c   :  { %707 = vmatpush.bf16.msrb.mxu0 %v1479_v7  ;;  %v1686_v6 = vld [vmem:[%s2698_s3 + $0x174] sm:$0xf]  ;;  %v1368_v7 = vld [vmem:[%s2698_s3 + $0x178] sm:$0xf0]  ;;  %v1721_v9 = vld [vmem:[%s2698_s3 + $0x284] sm:$0xf0]  ;;  %v1195_v16 = vor.u32 %v1642_v2, %v1192_v5 }
  0x2d   :  { %745 = vmatpush.bf16.msra.mxu3 %v1235_v11  ;;  %758 = vmatpush.bf16.msrb.mxu2 %v1299_v14  ;;  %v1658_v10 = vld [vmem:[%s2698_s3 + $0x94] sm:$0xf]  ;;  %v1256_v11 = vld [vmem:[%s2698_s3 + $0x98] sm:$0xf0]  ;;  %v45_v13 = vld [vmem:[%s2695_s0 + $0x20] sm:$0xff]  ;;  %v1371_v18 = vor.u32 %v1686_v6, %v1368_v7  ;;  %v1503_v19 = vor.u32 %v1721_v9, %v1502_v1 }
  0x2e   :  { %720 = vmatpush.bf16.msrb.mxu1 %v1543_v12  ;;  %v1439_v12 = vor.u32 %v1705_v63, %v1438_v61  ;;  %v1702_v14 = vld [vmem:[%s2698_s3 + $0x1f4] sm:$0xf]  ;;  %v1432_v15 = vld [vmem:[%s2698_s3 + $0x1f8] sm:$0xf0]  ;;  %v46_v17 = vld [vmem:[%s2695_s0 + $0x28] sm:$0xff]  ;;  %v2327_v25 = vpack.c.bf16 %v45_v13, %v45_v13 }
  0x2f   :  { %v1700_v21 = vld [vmem:[%s2698_s3 + $0x1e4] sm:$0xf]  ;;  %v1496_v27 = vld [vmem:[%s2698_s3 + $0x278] sm:$0xf0]  ;;  %v1248_v29 = vld [vmem:[%s2698_s3 + $0x88] sm:$0xf0]  ;;  %v2347_v33 = vpack.c.bf16 %v46_v17, %v46_v17 }
  0x30   :  { %708 = vmatpush.bf16.msrb.mxu0 %v1471_v20  ;;  %v1259_v20 = vor.u32 %v1658_v10, %v1256_v11  ;;  %v1640_v22 = vld [vmem:[%s2698_s3 + $0x4] sm:$0xf]  ;;  %v1424_v30 = vld [vmem:[%s2698_s3 + $0x1e8] sm:$0xf0]  ;;  %v1734_v31 = vld [vmem:[%s2698_s3 + $0x2f4] sm:$0xf] }
  0x31   :  { %746 = vmatpush.bf16.msra.mxu3 %v1227_v23  ;;  %759 = vmatpush.bf16.msrb.mxu2 %v1291_v26  ;;  %v1184_v23 = vld [vmem:[%s2698_s3 + $0x8] sm:$0xf0]  ;;  %v1435_v26 = vor.u32 %v1702_v14, %v1432_v15  ;;  %v1656_v28 = vld [vmem:[%s2698_s3 + $0x84] sm:$0xf]  ;;  %v1698_v40 = vld [vmem:[%s2698_s3 + $0x1d4] sm:$0xf] }
  0x32   :  { %721 = vmatpush.bf16.msrb.mxu1 %v1535_v24  ;;  %v1718_v24 = vld [vmem:[%s2698_s3 + $0x274] sm:$0xf]  ;;  %v1187_v34 = vor.u32 %v1640_v22, %v1184_v23  ;;  %v1684_v35 = vld [vmem:[%s2698_s3 + $0x164] sm:$0xf]  ;;  %v1251_v38 = vor.u32 %v1656_v28, %v1248_v29  ;;  %v1488_v43 = vld [vmem:[%s2698_s3 + $0x268] sm:$0xf0] }
  0x33   :  { %v1716_v42 = vld [vmem:[%s2698_s3 + $0x264] sm:$0xf]  ;;  %v1416_v44 = vld [vmem:[%s2698_s3 + $0x1d8] sm:$0xf0]  ;;  %v1552_v48 = vld [vmem:[%s2698_s3 + $0x2e8] sm:$0xf0] }
  0x34   :  { %709 = vmatpush.bf16.msrb.mxu0 %v1463_v32  ;;  %1572 = vmatmul.msk.bf16.vlgmr.msrb.gmra.mxu3 %vm649_vm0, %v2245_v45  ;;  %v1560_v32 = vld [vmem:[%s2698_s3 + $0x2f8] sm:$0xf0]  ;;  %v1732_v47 = vld [vmem:[%s2698_s3 + $0x2e4] sm:$0xf]  ;;  %v1491_v52 = vor.u32 %v1716_v42, %v1488_v43  ;;  %v1714_v57 = vld [vmem:[%s2698_s3 + $0x254] sm:$0xf] }
  0x35   :  { %747 = vmatpush.bf16.msra.mxu3 %v1219_v36  ;;  %760 = vmatpush.bf16.msrb.mxu2 %v1283_v39  ;;  %v1360_v36 = vld [vmem:[%s2698_s3 + $0x168] sm:$0xf0]  ;;  %v1427_v39 = vor.u32 %v1700_v21, %v1424_v30  ;;  %v1563_v41 = vor.u32 %v1734_v31, %v1560_v32  ;;  %v1696_v54 = vld [vmem:[%s2698_s3 + $0x1c4] sm:$0xf]  ;;  %v1555_v56 = vor.u32 %v1732_v47, %v1552_v48  ;;  %v1480_v58 = vld [vmem:[%s2698_s3 + $0x258] sm:$0xf0] }
  0x36   :  { %722 = vmatpush.bf16.msrb.mxu1 %v1527_v37  ;;  %v1499_v37 = vor.u32 %v1718_v24, %v1496_v27  ;;  %v1408_v59 = vld [vmem:[%s2698_s3 + $0x1c8] sm:$0xf0]  ;;  %v1730_v61 = vld [vmem:[%s2698_s3 + $0x2d4] sm:$0xf]  ;;  %v1544_v63 = vld [vmem:[%s2698_s3 + $0x2d8] sm:$0xf0]  ;;  %v1483_v2 = vor.u32 %v1714_v57, %v1480_v58 }
  0x37   :  { %v1344_v1 = vld [vmem:[%s2698_s3 + $0x148] sm:$0xf0]  ;;  %v1547_v5 = vor.u32 %v1730_v61, %v1544_v63 }
  0x38   :  { %710 = vmatpush.bf16.msrb.mxu0 %v1455_v46  ;;  %v1363_v46 = vor.u32 %v1684_v35, %v1360_v36  ;;  %v1472_v6 = vld [vmem:[%s2698_s3 + $0x248] sm:$0xf0] }
  0x39   :  { %748 = vmatpush.bf16.msra.mxu3 %v1211_v49  ;;  %761 = vmatpush.bf16.msrb.mxu2 %v1275_v53  ;;  %v1682_v49 = vld [vmem:[%s2698_s3 + $0x154] sm:$0xf]  ;;  %v1419_v53 = vor.u32 %v1698_v40, %v1416_v44 }
  0x3a   :  { %723 = vmatpush.bf16.msrb.mxu1 %v1519_v50  ;;  %v1352_v50 = vld [vmem:[%s2698_s3 + $0x158] sm:$0xf0] }
  0x3c   :  { %711 = vmatpush.bf16.msrb.mxu0 %v1447_v60  ;;  %v1355_v60 = vor.u32 %v1682_v49, %v1352_v50 }
  0x3d   :  { %749 = vmatpush.bf16.msra.mxu3 %v1203_v0  ;;  %762 = vmatpush.bf16.msrb.mxu2 %v1267_v4  ;;  %v1680_v0 = vld [vmem:[%s2698_s3 + $0x144] sm:$0xf]  ;;  %v1411_v4 = vor.u32 %v1696_v54, %v1408_v59 }
  0x3e   :  { %724 = vmatpush.bf16.msrb.mxu1 %v1511_v3  ;;  %v1694_v3 = vld [vmem:[%s2698_s3 + $0x1b4] sm:$0xf] }
  0x40   :  { %712 = vmatpush.bf16.msrb.mxu0 %v1439_v12 }
  0x41   :  { %750 = vmatpush.bf16.msra.mxu3 %v1195_v16  ;;  %763 = vmatpush.bf16.msrb.mxu2 %v1259_v20 }
  0x42   :  { %725 = vmatpush.bf16.msrb.mxu1 %v1503_v19 }
  0x43   :  { %713 = vmatmul.bf16.vlgmr.msrb.gmra.mxu0 %v2327_v25 }
  0x44   :  { %770 = vmatpush.bf16.msra.mxu0 %v1371_v18 }
  0x45   :  { %726 = vmatmul.bf16.vlgmr.msrb.gmra.mxu1 %v2347_v33  ;;  %751 = vmatpush.bf16.msra.mxu3 %v1187_v34 }
  0x46   :  { %783 = vmatpush.bf16.msra.mxu1 %v1435_v26  ;;  %764 = vmatpush.bf16.msrb.mxu2 %v1251_v38 }
  0x48   :  { %771 = vmatpush.bf16.msra.mxu0 %v1363_v46  ;;  %752 = vmatmul.bf16.vlgmr.msra.gmra.mxu3 %v2133_v55  ;;  %v1712_v55 = vld [vmem:[%s2698_s3 + $0x244] sm:$0xf] }
  0x49   :  { %796 = vmatpush.bf16.msrb.mxu3 %v1499_v37  ;;  %765 = vmatmul.bf16.vlgmr.msrb.gmra.mxu2 %v2144_v62 }
  0x4a   :  { %784 = vmatpush.bf16.msra.mxu1 %v1427_v39  ;;  %809 = vmatpush.bf16.msra.mxu2 %v1563_v41 }
  0x4d   :  { %797 = vmatpush.bf16.msrb.mxu3 %v1491_v52 }
  0x4e   :  { %785 = vmatpush.bf16.msra.mxu1 %v1419_v53  ;;  %810 = vmatpush.bf16.msra.mxu2 %v1555_v56 }
  0x4f   :  { %19 = vsyncpa [#allocation6], 0  ;;  %772 = vmatpush.bf16.msra.mxu0 %v1355_v60  ;;  %v1400_v62 = vld [vmem:[%s2698_s3 + $0x1b8] sm:$0xf0]  ;;  %v1347_v7 = vor.u32 %v1680_v0, %v1344_v1  ;;  %v1728_v9 = vld [vmem:[%s2698_s3 + $0x2c4] sm:$0xf]  ;;  %v1475_v13 = vor.u32 %v1712_v55, %v1472_v6 }
  0x50   :  { %v1536_v10 = vld [vmem:[%s2698_s3 + $0x2c8] sm:$0xf0]  ;;  %v1678_v11 = vld [vmem:[%s2698_s3 + $0x134] sm:$0xf]  ;;  %v1336_v12 = vld [vmem:[%s2698_s3 + $0x138] sm:$0xf0]  ;;  %v1403_v14 = vor.u32 %v1694_v3, %v1400_v62 }
  0x51   :  { %798 = vmatpush.bf16.msrb.mxu3 %v1483_v2  ;;  %v1692_v15 = vld [vmem:[%s2698_s3 + $0x1a4] sm:$0xf]  ;;  %v1539_v16 = vor.u32 %v1728_v9, %v1536_v10  ;;  %v1710_v17 = vld [vmem:[%s2698_s3 + $0x234] sm:$0xf]  ;;  %v1464_v18 = vld [vmem:[%s2698_s3 + $0x238] sm:$0xf0]  ;;  %v1339_v20 = vor.u32 %v1678_v11, %v1336_v12 }
  0x52   :  { %786 = vmatpush.bf16.msra.mxu1 %v1411_v4  ;;  %811 = vmatpush.bf16.msra.mxu2 %v1547_v5  ;;  %v1392_v19 = vld [vmem:[%s2698_s3 + $0x1a8] sm:$0xf0]  ;;  %v1726_v21 = vld [vmem:[%s2698_s3 + $0x2b4] sm:$0xf]  ;;  %v1528_v22 = vld [vmem:[%s2698_s3 + $0x2b8] sm:$0xf0]  ;;  %v1467_v26 = vor.u32 %v1710_v17, %v1464_v18 }
  0x53   :  { %773 = vmatpush.bf16.msra.mxu0 %v1347_v7  ;;  %v1676_v23 = vld [vmem:[%s2698_s3 + $0x124] sm:$0xf]  ;;  %v1328_v24 = vld [vmem:[%s2698_s3 + $0x128] sm:$0xf0]  ;;  %v1395_v27 = vor.u32 %v1692_v15, %v1392_v19  ;;  %v1690_v28 = vld [vmem:[%s2698_s3 + $0x194] sm:$0xf]  ;;  %v1531_v29 = vor.u32 %v1726_v21, %v1528_v22 }
  0x54   :  { %v1708_v30 = vld [vmem:[%s2698_s3 + $0x224] sm:$0xf]  ;;  %v1456_v31 = vld [vmem:[%s2698_s3 + $0x228] sm:$0xf0]  ;;  %v1384_v32 = vld [vmem:[%s2698_s3 + $0x198] sm:$0xf0]  ;;  %v1331_v34 = vor.u32 %v1676_v23, %v1328_v24 }
  0x55   :  { %799 = vmatpush.bf16.msrb.mxu3 %v1475_v13  ;;  %v1724_v35 = vld [vmem:[%s2698_s3 + $0x2a4] sm:$0xf]  ;;  %v1520_v36 = vld [vmem:[%s2698_s3 + $0x2a8] sm:$0xf0]  ;;  %v1674_v37 = vld [vmem:[%s2698_s3 + $0x114] sm:$0xf]  ;;  %v1459_v39 = vor.u32 %v1708_v30, %v1456_v31  ;;  %v1387_v41 = vor.u32 %v1690_v28, %v1384_v32 }
  0x56   :  { %787 = vmatpush.bf16.msra.mxu1 %v1403_v14  ;;  %812 = vmatpush.bf16.msra.mxu2 %v1539_v16  ;;  %v1320_v38 = vld [vmem:[%s2698_s3 + $0x118] sm:$0xf0]  ;;  %v1688_v40 = vld [vmem:[%s2698_s3 + $0x184] sm:$0xf]  ;;  %v1376_v42 = vld [vmem:[%s2698_s3 + $0x188] sm:$0xf0]  ;;  %v1523_v43 = vor.u32 %v1724_v35, %v1520_v36  ;;  %v857_v35 = vstv %s2697_s2 }
  0x57   :  { %774 = vmatpush.bf16.msra.mxu0 %v1339_v20  ;;  %v1706_v44 = vld [vmem:[%s2698_s3 + $0x214] sm:$0xf]  ;;  %v1448_v46 = vld [vmem:[%s2698_s3 + $0x218] sm:$0xf0]  ;;  %v1323_v47 = vor.u32 %v1674_v37, %v1320_v38  ;;  %v1672_v50 = vld [vmem:[%s2698_s3 + $0x104] sm:$0xf]  ;;  %v1379_v57 = vor.u32 %v1688_v40, %v1376_v42  ;;  %v842_v20 = vlaneseq }
  0x58   :  { %v1722_v48 = vld [vmem:[%s2698_s3 + $0x294] sm:$0xf]  ;;  %v1512_v49 = vld [vmem:[%s2698_s3 + $0x298] sm:$0xf0]  ;;  %v1312_v52 = vld [vmem:[%s2698_s3 + $0x108] sm:$0xf0]  ;;  %v1451_v56 = vor.u32 %v1706_v44, %v1448_v46 }
  0x59   :  { %800 = vmatpush.bf16.msrb.mxu3 %v1467_v26  ;;  %v1736_v53 = vld [vmem:[%s2698_s3 + $0x304] sm:$0xf]  ;;  %v1568_v54 = vld [vmem:[%s2698_s3 + $0x308] sm:$0xf0]  ;;  %v1515_v58 = vor.u32 %v1722_v48, %v1512_v49  ;;  %v1315_v61 = vor.u32 %v1672_v50, %v1312_v52  ;;  %v893_v55 = vld [vmem:[%s2700_s5 + $0xf0] sm:$0xff]  ;;  %s859_s13 = ssub.f32 1.0, %s2697_s2 }
  0x5a   :  { %788 = vmatpush.bf16.msra.mxu1 %v1395_v27  ;;  %813 = vmatpush.bf16.msra.mxu2 %v1531_v29  ;;  %v1704_v59 = vld [vmem:[%s2698_s3 + $0x204] sm:$0xf]  ;;  %v1440_v60 = vld [vmem:[%s2698_s3 + $0x208] sm:$0xf0]  ;;  %v1571_v1 = vor.u32 %v1736_v53, %v1568_v54  ;;  %v894_v4 = vld [vmem:[%s2700_s5 + $0xf8] sm:$0xff]  ;;  %v843_v27 = vand.u32 127, %v842_v20 }
  0x5b   :  { %775 = vmatpush.bf16.msra.mxu0 %v1331_v34  ;;  %v1720_v63 = vld [vmem:[%s2698_s3 + $0x284] sm:$0xf]  ;;  %v1504_v0 = vld [vmem:[%s2698_s3 + $0x288] sm:$0xf0]  ;;  %v1443_v2 = vor.u32 %v1704_v59, %v1440_v60  ;;  %v889_v62 = vld [vmem:[%s2700_s5 + $0xd0] sm:$0xff]  ;;  %v1821_v36 = vmov 0.0   ;;  %v860_v38 = vstv %s859_s13 }
  0x5c   :  { %v1507_v3 = vor.u32 %v1720_v63, %v1504_v0  ;;  %v891_v5 = vld [vmem:[%s2700_s5 + $0xe0] sm:$0xff]  ;;  %v892_v6 = vld [vmem:[%s2700_s5 + $0xe8] sm:$0xff]  ;;  %v881_v11 = vld [vmem:[%s2700_s5 + $0x90] sm:$0xff]  ;;  %s1166_s30 = sshll.u32 %s2706_s11, 4  ;;  %s1824_s14 = smov [#allocation3]   ;;  %s1167_s30 = int_to_ptr.hbm [resolvable:$true] %s1166_s30 }
  0x5d   :  { %801 = vmatpush.bf16.msrb.mxu3 %v1459_v39  ;;  %v887_v7 = vld [vmem:[%s2700_s5 + $0xc0] sm:$0xff]  ;;  %v884_v10 = vld [vmem:[%s2700_s5 + $0xa8] sm:$0xff]  ;;  %v882_v12 = vld [vmem:[%s2700_s5 + $0x98] sm:$0xff]  ;;  %s1153_s15 = sshll.u32 %s1824_s14, 4  ;;  %s1155_s18 = sshll.u32 %s2705_s10, 4  ;;  %s1154_s15 = int_to_ptr.vmem [resolvable:$true] %s1153_s15  ;;  %s1156_s18 = int_to_ptr.hbm [resolvable:$true] %s1155_s18 }
  0x5e   :  { %789 = vmatpush.bf16.msra.mxu1 %v1387_v41  ;;  %814 = vmatpush.bf16.msra.mxu2 %v1523_v43  ;;  %v883_v9 = vld [vmem:[%s2700_s5 + $0xa0] sm:$0xff]  ;;  %v880_v14 = vld [vmem:[%s2700_s5 + $0x88] sm:$0xff]  ;;  %v877_v15 = vld [vmem:[%s2700_s5 + $0x70] sm:$0xff] }
  0x5f   :  { %776 = vmatpush.bf16.msra.mxu0 %v1323_v47  ;;  %v879_v13 = vld [vmem:[%s2700_s5 + $0x80] sm:$0xff]  ;;  %v878_v16 = vld [vmem:[%s2700_s5 + $0x78] sm:$0xff]  ;;  %v876_v18 = vld [vmem:[%s2700_s5 + $0x68] sm:$0xff] }
  0x60   :  { %v875_v17 = vld [vmem:[%s2700_s5 + $0x60] sm:$0xff]  ;;  %v873_v19 = vld [vmem:[%s2700_s5 + $0x50] sm:$0xff]  ;;  %v872_v22 = vld [vmem:[%s2700_s5 + $0x48] sm:$0xff] }
  0x61   :  { %802 = vmatpush.bf16.msrb.mxu3 %v1451_v56  ;;  %v871_v21 = vld [vmem:[%s2700_s5 + $0x40] sm:$0xff]  ;;  %v869_v24 = vld [vmem:[%s2700_s5 + $0x30] sm:$0xff]  ;;  %v870_v26 = vld [vmem:[%s2700_s5 + $0x38] sm:$0xff] }
  0x62   :  { %790 = vmatpush.bf16.msra.mxu1 %v1379_v57  ;;  %815 = vmatpush.bf16.msra.mxu2 %v1515_v58  ;;  %v867_v28 = vld [vmem:[%s2700_s5 + $0x20] sm:$0xff]  ;;  %v868_v29 = vld [vmem:[%s2700_s5 + $0x28] sm:$0xff]  ;;  %v865_v30 = vld [vmem:[%s2700_s5 + $0x10] sm:$0xff] }
  0x63   :  { %777 = vmatpush.bf16.msra.mxu0 %v1315_v61  ;;  %v866_v31 = vld [vmem:[%s2700_s5 + $0x18] sm:$0xff]  ;;  %v863_v32 = vld [vmem:[%s2700_s5] sm:$0xff]  ;;  %v864_v34 = vld [vmem:[%s2700_s5 + $0x8] sm:$0xff] }
  0x64   :  { %v153_v44 = vld [vmem:[%s2699_s4] sm:$0x3] }
  0x65   :  { %791 = vmatmul.bf16.vlgmr.msra.gmra.mxu1 %v2122_v51  ;;  %803 = vmatpush.bf16.msrb.mxu3 %v1443_v2  ;;  %v890_v51 = vld [vmem:[%s2700_s5 + $0xd8] sm:$0xff]  ;;  %v155_v46 = vperm.slane %v153_v44, 0 }
  0x66   :  { %829 = vmatpush.bf16.msrb.mxu1 %v1571_v1  ;;  %816 = vmatpush.bf16.msra.mxu2 %v1507_v3 }
  0x67   :  { %778 = vmatmul.bf16.vlgmr.msra.gmra.mxu0 %v2166_v8  ;;  %v888_v8 = vld [vmem:[%s2700_s5 + $0xc8] sm:$0xff] }
  0x68   :  { %804 = vmatmul.bf16.vlgmr.msrb.gmra.mxu3 %v2327_v25  ;;  %v885_v25 = vld [vmem:[%s2700_s5 + $0xb0] sm:$0xff] }
  0x69   :  { %915 = vmatpush.msra.mxu3 %v894_v4  ;;  %817 = vmatmul.bf16.vlgmr.msra.gmra.mxu2 %v2347_v33  ;;  %v886_v33 = vld [vmem:[%s2700_s5 + $0xb8] sm:$0xff] }
  0x6a   :  { %895 = vmatpush.msra.mxu1 %v893_v55 }
  0x6b   :  { %916 = vmatpush.msra.mxu3 %v892_v6 }
  0x6c   :  { %896 = vmatpush.msra.mxu1 %v891_v5 }
  0x6d   :  { %917 = vmatpush.msra.mxu3 %v890_v51 }
  0x6e   :  { %897 = vmatpush.msra.mxu1 %v889_v62 }
  0x6f   :  { %918 = vmatpush.msra.mxu3 %v888_v8 }
  0x70   :  { %898 = vmatpush.msra.mxu1 %v887_v7 }
  0x71   :  { %919 = vmatpush.msra.mxu3 %v886_v33  ;;  %v156_v33 = vperm.slane %v153_v44, 1 }
  0x72   :  { %899 = vmatpush.msra.mxu1 %v885_v25 }
  0x73   :  { %920 = vmatpush.msra.mxu3 %v884_v10 }
  0x74   :  { %900 = vmatpush.msra.mxu1 %v883_v9  ;;  %v847_v23 = vpop.permute.xlu0 %846 }
  0x75   :  { %921 = vmatpush.msra.mxu3 %v882_v12  ;;  %1573 = vmatmul.msk.bf16.vlgmr.msrb.gmra.mxu1 %vm649_vm0, %v2245_v45  ;;  %v874_v45 = vld [vmem:[%s2700_s5 + $0x58] sm:$0xff]  ;;  %vm848_vm1 = vcmp.eq.s32.totalorder %v843_v27, %v847_v23 }
  0x76   :  { %901 = vmatpush.msra.mxu1 %v881_v11  ;;  %v1574_v37 = vsel %vm848_vm1, 1.0, %v1821_v36 }
  0x77   :  { %922 = vmatpush.msra.mxu3 %v880_v14  ;;  %v858_v41 = vmul.f32 %v1574_v37, %v857_v35  ;;  %v1745_v35 = vld [vmem:[%s2703_s8 + $0x38] sm:$0xff] }
  0x78   :  { %902 = vmatpush.msra.mxu1 %v879_v13  ;;  %1121 = vmatpush.bf16.msrb.mxu0 %v1745_v35 }
  0x79   :  { %923 = vmatpush.msra.mxu3 %v878_v16 }
  0x7a   :  { %903 = vmatpush.msra.mxu1 %v877_v15 }
  0x7b   :  { %924 = vmatpush.msra.mxu3 %v876_v18 }
  0x7c   :  { %904 = vmatpush.msra.mxu1 %v875_v17 }
  0x7d   :  { %925 = vmatpush.msra.mxu3 %v874_v45  ;;  %v853_v39 = vpop.permute.xlu0 %852 }
  0x7e   :  { %905 = vmatpush.msra.mxu1 %v873_v19  ;;  %vm854_vm2 = vcmp.eq.s32.totalorder %v843_v27, %v853_v39 }
  0x7f   :  { %926 = vmatpush.msra.mxu3 %v872_v22  ;;  %v1575_v40 = vsel %vm854_vm2, 1.0, %v1821_v36  ;;  %v1753_v36 = vld [vmem:[%s2703_s8 + $0x78] sm:$0xff] }
  0x80   :  { %906 = vmatpush.msra.mxu1 %v871_v21  ;;  %v861_v42 = vmul.f32 %v1575_v40, %v860_v38  ;;  %1134 = vmatpush.bf16.msrb.mxu2 %v1753_v36 }
  0x81   :  { %927 = vmatpush.msra.mxu3 %v870_v26 }
  0x82   :  { %907 = vmatpush.msra.mxu1 %v869_v24  ;;  %v862_v43 = vadd.f32 %v861_v42, %v858_v41 }
  0x83   :  { %928 = vmatpush.msra.mxu3 %v868_v29 }
  0x84   :  { %908 = vmatpush.msra.mxu1 %v867_v28 }
  0x85   :  { %929 = vmatpush.msra.mxu3 %v866_v31 }
  0x86   :  { %909 = vmatpush.msra.mxu1 %v865_v30 }
  0x87   :  { %930 = vmatpush.msra.mxu3 %v864_v34  ;;  %v1822_v34 = vmov 256.0  }
  0x88   :  { %910 = vmatpush.msra.mxu1 %v863_v32  ;;  %931 = vmatmul.f32.vlgmr.msra.gmra.mxu3 %v862_v43  ;;  %1763 = vrcp.f32 %v1822_v34 }
  0x89   :  { %911 = vmatmul.f32.vlgmr.msra.gmra.mxu1 %v862_v43 }
  0x8e   :  { %v1764_v37 = vpop.eup %1763 }
  0x8f   :  { %v941_v38 = vmul.f32 256.0, %v1764_v37  ;;  %vm945_vm5 = vweird.f32 %v1764_v37 }
  0x91   :  { %v942_v39 = vsub.f32 1.0, %v941_v38 }
  0x93   :  { %v943_v40 = vmul.f32 %v1764_v37, %v942_v39 }
  0x95   :  { %v944_v41 = vadd.f32 %v1764_v37, %v943_v40 }
  0x97   :  { %v946_v42 = vsel %vm945_vm5, %v1764_v37, %v944_v41 }
  0xa0   :  { %v662_v47 = vpop.f32.mrf.mxu0 }
  0xa1   :  { %v663_v48 = vadd.f32 %v662_v47, %v155_v46 }
  0xa4   :  { %v675_v49 = vpop.f32.mrf.mxu1 }
  0xa5   :  { %v676_v50 = vadd.f32 %v675_v49, %v663_v48 }
  0xa7   :  { %v701_v52 = vpop.f32.mrf.mxu3 }
  0xa8   :  { %v664_v53 = vpop.f32.mrf.mxu0 }
  0xa9   :  { %v1752_v53 = vld [vmem:[%s2703_s8 + $0x70] sm:$0xff] }
  0xaa   :  { %1135 = vmatpush.bf16.msrb.mxu2 %v1752_v53 }
  0xab   :  { %v688_v56 = vpop.f32.mrf.mxu2 }
  0xac   :  { %v677_v54 = vpop.f32.mrf.mxu1  ;;  %v689_v57 = vadd.f32 %v688_v56, %v676_v50  ;;  %v1751_v56 = vld [vmem:[%s2703_s8 + $0x68] sm:$0xff] }
  0xad   :  { %v1743_v54 = vld [vmem:[%s2703_s8 + $0x28] sm:$0xff] }
  0xae   :  { %v702_v59 = vadd.f32 %v701_v52, %v689_v57  ;;  %v1744_v52 = vld [vmem:[%s2703_s8 + $0x30] sm:$0xff]  ;;  %1136 = vmatpush.bf16.msrb.mxu2 %v1751_v56  ;;  %v1742_v57 = vld [vmem:[%s2703_s8 + $0x20] sm:$0xff] }
  0xaf   :  { %v703_v58 = vpop.f32.mrf.mxu3  ;;  %1122 = vmatpush.bf16.msrb.mxu0 %v1744_v52 }
  0xb0   :  { %v1750_v58 = vld [vmem:[%s2703_s8 + $0x60] sm:$0xff] }
  0xb2   :  { %1137 = vmatpush.bf16.msrb.mxu2 %v1750_v58 }
  0xb3   :  { %v690_v60 = vpop.f32.mrf.mxu2  ;;  %1123 = vmatpush.bf16.msrb.mxu0 %v1743_v54 }
  0xb4   :  { %v1749_v60 = vld [vmem:[%s2703_s8 + $0x58] sm:$0xff] }
  0xb6   :  { %1138 = vmatpush.bf16.msrb.mxu2 %v1749_v60 }
  0xb7   :  { %v740_v61 = vpop.f32.mrf.mxu3  ;;  %1124 = vmatpush.bf16.msrb.mxu0 %v1742_v57 }
  0xbf   :  { %v742_v2 = vpop.f32.mrf.mxu3 }
  0xc0   :  { %v714_v63 = vpop.f32.mrf.mxu0  ;;  %v1738_v2 = vld [vmem:[%s2703_s8] sm:$0xff] }
  0xc1   :  { %v715_v0 = vadd.f32 %v714_v63, %v702_v59  ;;  %v1741_v59 = vld [vmem:[%s2703_s8 + $0x18] sm:$0xff]  ;;  %v1748_v63 = vld [vmem:[%s2703_s8 + $0x50] sm:$0xff] }
  0xc2   :  { %v727_v1 = vpop.f32.mrf.mxu1  ;;  %1125 = vmatpush.bf16.msrb.mxu0 %v1741_v59  ;;  %1139 = vmatpush.bf16.msrb.mxu2 %v1748_v63 }
  0xc3   :  { %v728_v3 = vadd.f32 %v727_v1, %v715_v0  ;;  %v1739_v0 = vld [vmem:[%s2703_s8 + $0x8] sm:$0xff] }
  0xc4   :  { %v1747_v1 = vld [vmem:[%s2703_s8 + $0x48] sm:$0xff] }
  0xc5   :  { %v741_v55 = vadd.f32 %v740_v61, %v728_v3  ;;  %v1740_v61 = vld [vmem:[%s2703_s8 + $0x10] sm:$0xff]  ;;  %v1746_v3 = vld [vmem:[%s2703_s8 + $0x40] sm:$0xff] }
  0xc6   :  { %1126 = vmatpush.bf16.msrb.mxu0 %v1740_v61  ;;  %1140 = vmatpush.bf16.msrb.mxu2 %v1747_v1 }
  0xc7   :  { %v837_v23 = vmul.f32 0.01, %v741_v55  ;;  %vm835_vm3 = vcmp.gt.f32.partialorder %v741_v55, 0.0 }
  0xc8   :  { %v716_v4 = vpop.f32.mrf.mxu0 }
  0xc9   :  { %v839_v27 = vsel %vm835_vm3, %v741_v55, %v837_v23  ;;  %v1762_v23 = vld [vmem:[%s2704_s9] ss:$0 sm:$0xff] }
  0xca   :  { %v729_v5 = vpop.f32.mrf.mxu1  ;;  %1127 = vmatpush.bf16.msrb.mxu0 %v1739_v0  ;;  %1141 = vmatpush.bf16.msrb.mxu2 %v1746_v3 }
  0xcb   :  { %v753_v6 = vpop.f32.mrf.mxu3 }
  0xcc   :  { %v766_v62 = vpop.f32.mrf.mxu2  ;;  %v754_v13 = vadd.f32 %v753_v6, %v156_v33 }
  0xce   :  { %v767_v14 = vadd.f32 %v766_v62, %v754_v13  ;;  %1128 = vmatpush.bf16.msrb.mxu0 %v1738_v2 }
  0xd3   :  { %v755_v51 = vpop.f32.mrf.mxu3 }
  0xd4   :  { %v768_v7 = vpop.f32.mrf.mxu2 }
  0xe2   :  { %v792_v8 = vpop.f32.mrf.mxu1 }
  0xe4   :  { %v779_v25 = vpop.f32.mrf.mxu0 }
  0xe5   :  { %v780_v18 = vadd.f32 %v779_v25, %v767_v14  ;;  %v969_v25 = vld [vmem:[%s2701_s6] sm:$0x3]  ;;  %s1823_s6 = smov [#allocation5]  }
  0xe7   :  { %v793_v19 = vadd.f32 %v792_v8, %v780_v18 }
  0xea   :  { %v794_v9 = vpop.f32.mrf.mxu1 }
  0xeb   :  { %v805_v10 = vpop.f32.mrf.mxu3  ;;  %v977_v9 = vld [vmem:[%s2702_s7] sm:$0x3]  ;;  %s1164_s7 = sshll.u32 %s1823_s6, 4  ;;  %s1165_s7 = int_to_ptr.vmem [resolvable:$true] %s1164_s7 }
  0xec   :  { %v818_v11 = vpop.f32.mrf.mxu2  ;;  %v781_v12 = vpop.f32.mrf.mxu0  ;;  %v806_v20 = vadd.f32 %v805_v10, %v793_v19  ;;  %v971_v10 = vperm.slane %v969_v25, 0 }
  0xee   :  { %v819_v21 = vadd.f32 %v818_v11, %v806_v20  ;;  %v972_v11 = vperm.slane %v969_v25, 1 }
  0xf2   :  { %v831_v15 = vpop.f32.mrf.mxu1 }
  0xf3   :  { %v807_v16 = vpop.f32.mrf.mxu3  ;;  %v832_v22 = vadd.f32 %v831_v15, %v819_v21  ;;  %v979_v15 = vperm.slane %v977_v9, 0 }
  0xf4   :  { %v820_v17 = vpop.f32.mrf.mxu2  ;;  %v980_v16 = vperm.slane %v977_v9, 1 }
  0xf5   :  { %v838_v24 = vmul.f32 0.01, %v832_v22  ;;  %vm836_vm4 = vcmp.gt.f32.partialorder %v832_v22, 0.0 }
  0xf7   :  { %v840_v28 = vsel %vm836_vm4, %v832_v22, %v838_v24 }
  0xfa   :  { %v833_v45 = vpop.f32.mrf.mxu1 }
 0x106   :  { %v912_v26 = vpop.f32.mrf.mxu1 }
 0x107   :  { %v935_v30 = vadd.f32 %v912_v26, %v839_v27 }
 0x10b   :  { %v932_v29 = vpop.f32.mrf.mxu3 }
 0x10c   :  { %v936_v31 = vadd.f32 %v932_v29, %v840_v28 }
 0x10e   :  { %v937_v32 = vadd.f32 %v936_v31, %v935_v30 }
 0x110   :  { %938 = vadd.xlane.f32.xlu1 %v937_v32 }
 0x183   :  { %v939_v43 = vpop.xlane.xlu1 %938 }
 0x184   :  { %v947_v44 = vmul.f32 %v946_v42, %v939_v43 }
 0x186   :  { %v948_v46 = vsub.f32 %v935_v30, %v947_v44  ;;  %v949_v47 = vsub.f32 %v936_v31, %v947_v44 }
 0x188   :  { %v950_v48 = vmul.f32 %v948_v46, %v948_v46  ;;  %v951_v49 = vmul.f32 %v949_v47, %v949_v47 }
 0x18a   :  { %v952_v50 = vadd.f32 %v951_v49, %v950_v48 }
 0x18c   :  { %953 = vadd.xlane.f32.xlu1 %v952_v50 }
 0x1ff   :  { %v954_v55 = vpop.xlane.xlu1 %953 }
 0x200   :  { %v955_v4 = vmul.f32 %v954_v55, %v946_v42 }
 0x202   :  { %v956_v5 = vadd.f32 1e-05, %v955_v4 }
 0x204   :  { %1765 = vrsqrt.f32 %v956_v5  ;;  %vm963_vm7 = vweird.f32 %v956_v5 }
 0x20a   :  { %v1766_v6 = vpop.eup %1765 }
 0x20b   :  { %v958_v62 = vmul.f32 %v1766_v6, %v956_v5  ;;  %vm964_vm6 = vweird.f32 %v1766_v6 }
 0x20c   :  { %vm965_vm8 = vmor %vm963_vm7, %vm964_vm6 }
 0x20d   :  { %v959_v51 = vmul.f32 %v1766_v6, %v958_v62 }
 0x20f   :  { %v960_v7 = vmul.f32 0.5, %v959_v51 }
 0x211   :  { %v961_v8 = vsub.f32 1.5, %v960_v7 }
 0x213   :  { %v962_v33 = vmul.f32 %v1766_v6, %v961_v8 }
 0x215   :  { %v966_v12 = vsel %vm965_vm8, %v1766_v6, %v962_v33 }
 0x216   :  { %v967_v13 = vmul.f32 %v966_v12, %v948_v46  ;;  %v968_v14 = vmul.f32 %v966_v12, %v949_v47 }
 0x218   :  { %v975_v17 = vmul.f32 %v971_v10, %v967_v13  ;;  %v976_v18 = vmul.f32 %v972_v11, %v968_v14 }
 0x21a   :  { %v983_v19 = vadd.f32 %v979_v15, %v975_v17  ;;  %v984_v45 = vadd.f32 %v980_v16, %v976_v18 }
 0x21c   :  { %v987_v20 = vpack.c.bf16 %v983_v19, %v983_v19  ;;  %985 = vst [vmem:[#allocation5] sm:$0xff] %v983_v19  ;;  %v988_v21 = vpack.c.bf16 %v984_v45, %v984_v45 }
 0x21d   :  { %986 = vst [vmem:[#allocation5 + $0x8] sm:$0xff] %v984_v45 }
 0x21e   :  { %1129 = vmatmul.bf16.vlgmr.msrb.gmra.mxu0 %v987_v20  ;;  %1142 = vmatmul.bf16.vlgmr.msrb.gmra.mxu2 %v988_v21  ;;  %1169 = dma.vmem_to_hbm [thread:$0]  %s1165_s7, 256, %s1167_s30, [#allocation6]  }
 0x29b   :  { %v1130_v22 = vpop.f32.mrf.mxu0 }
 0x29c   :  { %v1131_v24 = vadd.f32 %v1762_v23, %v1130_v22 }
 0x2a1   :  { %v1143_v26 = vpop.f32.mrf.mxu2 }
 0x2a2   :  { %v1144_v27 = vadd.f32 %v1143_v26, %v1131_v24 }
 0x2a3   :  { %v1132_v28 = vpop.f32.mrf.mxu0 }
 0x2a4   :  { %1147 = vst [vmem:[#allocation3] sm:$0xff] %v1144_v27 }
 0x2a5   :  { %1158 = dma.vmem_to_hbm [thread:$0]  %s1154_s15, 128, %s1156_s18, [#allocation4]  }
 0x2a9   :  { %v1145_v29 = vpop.f32.mrf.mxu2 }
 0x2aa   :  { %1815 = dma.done.wait [#allocation4], 128  }
 0x2ab   :  { %1816 = vsyncadd [#allocation4], 4294967168 }
 0x2ac   :  { %1817 = dma.done.wait [#allocation6], 256  }
 0x2ad   :  { %1818 = vsyncadd [#allocation6], 4294967040 }
 0x2ae   :  { %1178 = vsyncpa [#allocation4], 1 }
 0x2af   :  { %1179 = vsyncpa [#allocation6], 1 }

</bundles_post_ra>
